<compile_context>
chip_gen: v6e
topology: v6e:2x2x1
jax: 0.10.0
libtpu: 0.0.40
codegen_flags: <defaults>
</compile_context>

<pallas_src>
import functools

import jax
import jax.numpy as jnp
from jax import lax
from jax.experimental import pallas as pl
from jax.experimental.pallas import tpu as pltpu

_LANES = 128
_ACC_SUBLANES = 8  # accumulator vreg shape (8, 128)


def _round_up(x: int, m: int) -> int:
    return (x + m - 1) // m * m


def _sublane_multiple(dtype) -> int:
    # 8 rows/vreg for 4-byte dtypes, 16 for 2-byte (bf16), 32 for 1-byte.
    return max(8, 32 // jnp.dtype(dtype).itemsize)


def _generation_defaults():
    """(max_tile_rows, vmem_limit_bytes) tuned per TPU generation."""
    kind = ""
    try:
        kind = jax.devices()[0].device_kind.lower()
    except Exception:
        pass
    if ("v5e" in kind) or ("v5 lite" in kind) or ("v5lite" in kind):
        # v5e: 16 MiB scoped-VMEM default, ~0.82 TB/s HBM -> 4096-row tiles
        # (2 MiB/input block, 8 MiB double-buffered) are already well amortized.
        return 4096, 32 * 1024 * 1024
    # v6e / v7x (v5p/v4 fall through harmlessly): 8192-row tiles
    # (4 MiB/input block f32, 16 MiB double-buffered). 48 MiB scoped limit
    # leaves ~25% headroom on v7x's 64 MiB physical VMEM.
    return 8192, 48 * 1024 * 1024


# ----------------------------------------------------------------------------
# Pallas kernel: per-core sum of squared errors with a VMEM vector accumulator.
# ----------------------------------------------------------------------------
def _sse_kernel(o_ref, t_ref, sse_ref, acc_ref, *, tile_rows, steps_per_core,
                valid_rows, needs_mask):
    i = pl.program_id(1)

    @pl.when(i == 0)
    def _():
        acc_ref[...] = jnp.zeros_like(acc_ref)

    # Upcast inside the kernel (keeps HBM traffic at the input dtype width).
    diff = o_ref[...].astype(jnp.float32) - t_ref[...].astype(jnp.float32)

    if needs_mask:
        # Tail / duplicated blocks: out-of-bounds rows hold unspecified data,
        # so they MUST be zeroed before squaring/accumulation.  The mask uses
        # the *unclamped* global row index, so clamped duplicate blocks (from
        # an odd block count split across 2 cores) contribute exactly zero.
        c = pl.program_id(0)
        row0 = (c * steps_per_core + i) * tile_rows
        local_row = lax.broadcasted_iota(jnp.int32, (tile_rows, _LANES), 0)
        diff = jnp.where(row0 + local_row < valid_rows, diff, 0.0)

    sq = diff * diff
    # Fold the tile down to an (8,128) partial-sum vreg using only VPU adds
    # (sum over the leading, vreg-indexed axis — no cross-lane traffic).
    acc_ref[...] += jnp.sum(
        sq.reshape(tile_rows // _ACC_SUBLANES, _ACC_SUBLANES, _LANES), axis=0)

    # Single expensive cross-lane reduce + scalar store, once per core.
    @pl.when(i == steps_per_core - 1)
    def _():
        sse_ref[0, 0] = jnp.sum(acc_ref[...])


def _mse_loss_pallas(outputs: jax.Array, targets: jax.Array, *,
                     max_tile_rows: int | None = None) -> jax.Array:
    """MSE over all elements, computed with a Pallas reduction kernel."""
    assert outputs.shape == targets.shape
    n_elem = outputs.size

    default_tile, vmem_limit = _generation_defaults()
    if max_tile_rows is None:
        max_tile_rows = default_tile

    sub = max(_sublane_multiple(outputs.dtype), _sublane_multiple(targets.dtype))
    n_rows = pl.cdiv(n_elem, _LANES)

    if n_rows <= max_tile_rows:
        # Single block along rows: round the block (and the tiny pad) up to the
        # dtype-aware sublane multiple so the in-kernel (.,8,128) fold is legal.
        tile_rows = _round_up(max(n_rows, 1), sub)
        padded_rows = tile_rows
    else:
        # Large input: no row padding — the ragged tail block is masked
        # in-kernel instead of materializing a padded HBM copy.
        tile_rows = max_tile_rows          # multiple of 32 -> legal for all dtypes
        padded_rows = n_rows

    o_flat = outputs.reshape(-1)
    t_flat = targets.reshape(-1)
    pad = padded_rows * _LANES - n_elem
    if pad:
        # Only hit when n_elem is not 128-aligned (or for tiny single-block
        # inputs); zero padding contributes 0 to the SSE.
        o_flat = jnp.pad(o_flat, (0, pad))
        t_flat = jnp.pad(t_flat, (0, pad))
    o2 = o_flat.reshape(padded_rows, _LANES)
    t2 = t_flat.reshape(padded_rows, _LANES)

    nblocks = pl.cdiv(padded_rows, tile_rows)
    num_cores = 2 if nblocks >= 2 else 1          # size-2 "parallel" axis (v7x)
    steps_per_core = pl.cdiv(nblocks, num_cores)
    duplicates = num_cores * steps_per_core - nblocks
    needs_mask = (padded_rows % tile_rows != 0) or (duplicates > 0)

    if duplicates:
        # Clamp the block index so the DMA never starts fully out of bounds;
        # the in-kernel mask (unclamped index) zeroes the duplicate's data.
        def in_map(c, i):
            return (jnp.minimum(c * steps_per_core + i, nblocks - 1), 0)
    else:
        def in_map(c, i):
            return (c * steps_per_core + i, 0)

    kernel = functools.partial(
        _sse_kernel, tile_rows=tile_rows, steps_per_core=steps_per_core,
        valid_rows=padded_rows, needs_mask=needs_mask)

    itemsize = outputs.dtype.itemsize + targets.dtype.itemsize
    partials = pl.pallas_call(
        kernel,
        out_shape=jax.ShapeDtypeStruct((num_cores, 1), jnp.float32),
        grid_spec=pltpu.PrefetchScalarGridSpec(
            num_scalar_prefetch=0,
            grid=(num_cores, steps_per_core),
            in_specs=[
                pl.BlockSpec((tile_rows, _LANES), in_map),
                pl.BlockSpec((tile_rows, _LANES), in_map),
            ],
            out_specs=pl.BlockSpec(
                (1, 1), lambda c, i: (c, 0), memory_space=pltpu.SMEM
            ),
            scratch_shapes=[pltpu.VMEM((_ACC_SUBLANES, _LANES), jnp.float32)],
        ),
        compiler_params=pltpu.CompilerParams(
            dimension_semantics=("parallel", "arbitrary"),
            vmem_limit_bytes=vmem_limit,
        ),
        cost_estimate=pl.CostEstimate(
            flops=3 * n_elem,
            transcendentals=0,
            bytes_accessed=n_elem * itemsize + 4 * num_cores,
        ),
    )(o2, t2)

    sse = jnp.sum(partials)                       # sum per-core partials
    return (sse / jnp.float32(n_elem)).astype(jnp.float32)


# ----------------------------------------------------------------------------
# DefaultLossWrapper equivalent
# ----------------------------------------------------------------------------
class DefaultLossWrapperPallas:
    """Mirrors src/losses.py::DefaultLossWrapper.forward semantics."""

    def __init__(self, loss_func, config, net_idx):
        self.loss_func = loss_func
        name = ""
        for i in range(len(config.lossComponents)):
            name = (f"{config.lossComponents[i]}_{config.lossComponentBlending[i]}"
                    if i == 0 else
                    f"{name}_{config.lossComponents[i]}_{config.lossComponentBlending[i]}")
        self._name = name
        # Stored like the PyTorch module, but (matching forward) NOT applied.
        self.weight = float(config.lossWeights[net_idx])

    def __call__(self, outputs, targets, **kwargs):
        loss_value = self.loss_func(outputs, targets)
        _ = kwargs.get("epoch", -1)  # read-but-unused, matching the reference
        return loss_value


if __name__ == "__main__":
    from types import SimpleNamespace

    key = jax.random.PRNGKey(0)
    k1, k2 = jax.random.split(key)

    cfg = SimpleNamespace(lossComponents=["mse"], lossComponentBlending=[1.0],
                          lossWeights=[1.0])
    wrapper = DefaultLossWrapperPallas(_mse_loss_pallas, cfg, net_idx=0)

    # Small NCHW shapes consistent with the module's usage.
    B, C, H, W = 2, 4, 16, 16
    outputs = jax.random.normal(k1, (B, C, H, W), dtype=jnp.float32)
    targets = jax.random.normal(k2, (B, C, H, W), dtype=jnp.float32)
    loss = jax.block_until_ready(wrapper(outputs, targets, epoch=3))
    ref = jnp.mean((outputs - targets) ** 2)
    assert jnp.allclose(loss, ref, rtol=1e-5, atol=1e-6), (loss, ref)

    # Non-128-aligned element count -> tiny lane pad, still exact.
    x = jax.random.normal(k1, (3, 5, 17, 13), dtype=jnp.float32)
    y = jax.random.normal(k2, (3, 5, 17, 13), dtype=jnp.float32)
    loss2 = jax.block_until_ready(wrapper(x, y))
    ref2 = jnp.mean((x - y) ** 2)
    assert jnp.allclose(loss2, ref2, rtol=1e-5, atol=1e-6), (loss2, ref2)

    # bf16 inputs: dtype-aware sublane rounding + in-kernel f32 upcast.
    xb, yb = x.astype(jnp.bfloat16), y.astype(jnp.bfloat16)
    loss3 = jax.block_until_ready(wrapper(xb, yb))
    ref3 = jnp.mean((xb.astype(jnp.float32) - yb.astype(jnp.float32)) ** 2)
    assert jnp.allclose(loss3, ref3, rtol=1e-3, atol=1e-4), (loss3, ref3)

    # Multi-block grids at small sizes (tile override) to exercise the
    # two-core split, the masked ragged tail, and the clamped duplicate block.
    a = jax.random.normal(k1, (4, 8, 32, 32), dtype=jnp.float32)   # 256 rows
    b = jax.random.normal(k2, (4, 8, 32, 32), dtype=jnp.float32)
    ref_ab = jnp.mean((a - b) ** 2)
    loss4 = jax.block_until_ready(_mse_loss_pallas(a, b, max_tile_rows=64))
    assert jnp.allclose(loss4, ref_ab, rtol=1e-5, atol=1e-6), (loss4, ref_ab)
    loss5 = jax.block_until_ready(_mse_loss_pallas(a, b, max_tile_rows=96))
    assert jnp.allclose(loss5, ref_ab, rtol=1e-5, atol=1e-6), (loss5, ref_ab)

    c_ = jax.random.normal(k1, (2, 3, 37, 41), dtype=jnp.float32)  # ragged, 72 rows
    d_ = jax.random.normal(k2, (2, 3, 37, 41), dtype=jnp.float32)
    loss6 = jax.block_until_ready(_mse_loss_pallas(c_, d_, max_tile_rows=64))
    ref6 = jnp.mean((c_ - d_) ** 2)
    assert jnp.allclose(loss6, ref6, rtol=1e-5, atol=1e-6), (loss6, ref6)

    print("KERNEL_OK")
</pallas_src>

<mosaic_0001>
module attributes {stable_mosaic.version = 11 : i64} {
  func.func @_sse_kernel(%arg0: i32, %arg1: i32, %arg2: memref<16x128xf32, #tpu.memory_space<vmem>>, %arg3: memref<16x128xf32, #tpu.memory_space<vmem>>, %arg4: memref<1x1xf32, #tpu.memory_space<smem>>, %arg5: memref<8x128xf32, #tpu.memory_space<vmem>>) attributes {dimension_semantics = [#tpu.dimension_semantics<parallel>, #tpu.dimension_semantics<arbitrary>], iteration_bounds = array<i64: 1, 1>, scalar_prefetch = 0 : i64, scratch_operands = 1 : i64, tpu.core_type = #tpu.core_type<tc>, window_params = [{transform_indices = @transform_0, window_bounds = array<i64: 16, 128>}, {transform_indices = @transform_1, window_bounds = array<i64: 16, 128>}, {transform_indices = @transform_2, window_bounds = array<i64: 1, 1>}]} {
    %c0_i32 = arith.constant 0 : i32
    %0 = arith.cmpi eq, %arg1, %c0_i32 : i32
    %1 = arith.extui %0 : i1 to i32
    %c0_i32_0 = arith.constant 0 : i32
    %2 = arith.cmpi ne, %1, %c0_i32_0 : i32
    scf.if %2 {
      %cst_10 = arith.constant 0.000000e+00 : f32
      %15 = vector.broadcast %cst_10 : f32 to vector<8x128xf32>
      %c0_11 = arith.constant 0 : index
      %c0_12 = arith.constant 0 : index
      %16 = vector.load %arg5[%c0_11, %c0_12] : memref<8x128xf32, #tpu.memory_space<vmem>>, vector<8x128xf32>
      tpu.vector_store %arg5[%c0_11, %c0_12], %15 {strides = array<i32>} : memref<8x128xf32, #tpu.memory_space<vmem>>, vector<8x128xf32>,
    } else {
    }
    %c0 = arith.constant 0 : index
    %c0_1 = arith.constant 0 : index
    %3 = vector.load %arg2[%c0, %c0_1] : memref<16x128xf32, #tpu.memory_space<vmem>>, vector<16x128xf32>
    %c0_2 = arith.constant 0 : index
    %c0_3 = arith.constant 0 : index
    %4 = vector.load %arg3[%c0_2, %c0_3] : memref<16x128xf32, #tpu.memory_space<vmem>>, vector<16x128xf32>
    %5 = arith.subf %3, %4 : vector<16x128xf32>
    %6 = arith.mulf %5, %5 : vector<16x128xf32>
    %c0_4 = arith.constant 0 : index
    %c0_5 = arith.constant 0 : index
    %7 = vector.load %arg5[%c0_4, %c0_5] : memref<8x128xf32, #tpu.memory_space<vmem>>, vector<8x128xf32>
    %8 = vector.shape_cast %6 : vector<16x128xf32> to vector<2x8x128xf32>
    %cst = arith.constant dense<0.000000e+00> : vector<8x128xf32>
    %9 = vector.multi_reduction <add>, %8, %cst [0] : vector<2x8x128xf32> to vector<8x128xf32>
    %10 = arith.addf %7, %9 : vector<8x128xf32>
    %c0_6 = arith.constant 0 : index
    %c0_7 = arith.constant 0 : index
    %11 = vector.load %arg5[%c0_6, %c0_7] : memref<8x128xf32, #tpu.memory_space<vmem>>, vector<8x128xf32>
    tpu.vector_store %arg5[%c0_6, %c0_7], %10 {strides = array<i32>} : memref<8x128xf32, #tpu.memory_space<vmem>>, vector<8x128xf32>,
    %c0_i32_8 = arith.constant 0 : i32
    %12 = arith.cmpi eq, %arg1, %c0_i32_8 : i32
    %13 = arith.extui %12 : i1 to i32
    %c0_i32_9 = arith.constant 0 : i32
    %14 = arith.cmpi ne, %13, %c0_i32_9 : i32
    scf.if %14 {
      %c0_10 = arith.constant 0 : index
      %c0_11 = arith.constant 0 : index
      %15 = vector.load %arg5[%c0_10, %c0_11] : memref<8x128xf32, #tpu.memory_space<vmem>>, vector<8x128xf32>
      %16 = vector.shape_cast %15 : vector<8x128xf32> to vector<1x8x128xf32>
      %cst_12 = arith.constant dense<0.000000e+00> : vector<1xf32>
      %17 = vector.multi_reduction <add>, %16, %cst_12 [1, 2] : vector<1x8x128xf32> to vector<1xf32>
      %18 = vector.shape_cast %17 : vector<1xf32> to vector<1x1x1xf32>
      %19 = vector.extract %18[0, 0, 0] : f32 from vector<1x1x1xf32>
      %c0_13 = arith.constant 0 : index
      %c0_14 = arith.constant 0 : index
      %20 = memref.load %arg4[%c0_13, %c0_14] : memref<1x1xf32, #tpu.memory_space<smem>>
      memref.store %19, %arg4[%c0_13, %c0_14] : memref<1x1xf32, #tpu.memory_space<smem>>
    } else {
    }
    return
  }
  func.func @transform_0(%arg0: i32, %arg1: i32) -> (i32, i32) {
    %c1_i32 = arith.constant 1 : i32
    %0 = arith.muli %arg0, %c1_i32 : i32
    %1 = arith.addi %0, %arg1 : i32
    %c0_i32 = arith.constant 0 : i32
    %c0_i32_0 = arith.constant 0 : i32
    return %1, %c0_i32 : i32, i32
  }
  func.func @transform_1(%arg0: i32, %arg1: i32) -> (i32, i32) {
    %c1_i32 = arith.constant 1 : i32
    %0 = arith.muli %arg0, %c1_i32 : i32
    %1 = arith.addi %0, %arg1 : i32
    %c0_i32 = arith.constant 0 : i32
    %c0_i32_0 = arith.constant 0 : i32
    return %1, %c0_i32 : i32, i32
  }
  func.func @transform_2(%arg0: i32, %arg1: i32) -> (i32, i32) {
    %c0_i32 = arith.constant 0 : i32
    %c0_i32_0 = arith.constant 0 : i32
    return %arg0, %c0_i32 : i32, i32
  }
}

</mosaic_0001>

<bundles_post_ra>
// kernel: tpu_custom_call.1
= control target key start
LH: loop header
LB: loop body
LE: loop exit
PB: predicated region body
PF: predicated region fallthrough
CT: control target
= control target key end

     0   :  { %7 = vsyncpa [#allocation4], 0  ;;  %s189_s0 = inlined_call_operand.hbm [shape: f32[16,128], index: 0, kind: input, shape index: {}]   ;;  %s190_s1 = inlined_call_operand.hbm [shape: f32[16,128], index: 1, kind: input, shape index: {}]   ;;  %s191_s2 = inlined_call_operand.hbm [shape: f32[1,1], index: 2, kind: output, shape index: {}]  }
   0x1   :  { %8 = vsyncpa [#allocation7], 0 }
   0x2   :  { %9 = vsyncpa [#allocation5], 0  ;;  %s160_s9 = smov [#allocation3]  }
   0x3   :  { %s19_s10 = sshll.u32 %s160_s9, 4  ;;  %s20_s10 = int_to_ptr.vmem [resolvable:$true] %s19_s10 }
   0x4   :  { %s114_s11 = scalar_lea.vmem %s20_s10, 256  ;;  %p119_p1 = scmp.lt.s32.totalorder %s20_s10, %s20_s10 }
   0x5   :  { %p115_p0 = scmp.ne.s32.totalorder %s20_s10, %s114_s11  ;;  %p120_p2 = scmp.lt.s32.totalorder %s114_s11, %s114_s11 }
   0x7   :  { %p121_p3 = por %p120_p2, %p119_p1 }
   0x9   :  { %p122_p4 = pnand %p121_p3, %p115_p0 }
   0xb   :  { %125 = shalt.err (!%p122_p4)
}
   0xc   :  { %s161_s12 = smov 128   ;;  %s162_s13 = smov 8  }
   0xd   :  { %25 = dma.hbm_to_vmem [thread:$0]  %s189_s0, 256, %s20_s10, [#allocation4], %s161_s12, %s161_s12, %s162_s13  }
   0xe   :  { %s163_s16 = smov [#allocation6]  }
   0xf   :  { %s35_s17 = sshll.u32 %s163_s16, 4  ;;  %s36_s17 = int_to_ptr.vmem [resolvable:$true] %s35_s17 }
  0x10   :  { %s134_s18 = scalar_lea.vmem %s36_s17, 256  ;;  %p139_p6 = scmp.lt.s32.totalorder %s36_s17, %s36_s17 }
  0x11   :  { %p135_p5 = scmp.ne.s32.totalorder %s36_s17, %s134_s18  ;;  %p140_p7 = scmp.lt.s32.totalorder %s134_s18, %s134_s18 }
  0x13   :  { %p141_p8 = por %p140_p7, %p139_p6 }
  0x15   :  { %p142_p9 = pnand %p141_p8, %p135_p5 }
  0x17   :  { %145 = shalt.err (!%p142_p9)
}
  0x18   :  { %41 = dma.hbm_to_vmem [thread:$0]  %s190_s1, 256, %s36_s17, [#allocation7], %s161_s12, %s161_s12, %s162_s13  }
  0x19   :  { %154 = dma.done.wait [#allocation4], 256  }
  0x1a   :  { %155 = vsyncadd [#allocation4], 4294967040 }
  0x1b   :  { %156 = dma.done.wait [#allocation7], 256  }
  0x1c   :  { %157 = vsyncadd [#allocation7], 4294967040  ;;  %v57_v0 = vld [vmem:[#allocation3] sm:$0xff]  ;;  %v58_v1 = vld [vmem:[#allocation3 + $0x8] sm:$0xff]  ;;  %s164_s1 = smov [#allocation8]  }
  0x1d   :  { %v59_v2 = vld [vmem:[#allocation6] sm:$0xff]  ;;  %v60_v3 = vld [vmem:[#allocation6 + $0x8] sm:$0xff] }
  0x1e   :  { %v61_v4 = vsub.f32 %v57_v0, %v59_v2  ;;  %v62_v5 = vsub.f32 %v58_v1, %v60_v3 }
  0x20   :  { %v63_v6 = vmul.f32 %v61_v4, %v61_v4  ;;  %v64_v7 = vmul.f32 %v62_v5, %v62_v5 }
  0x22   :  { %v66_v8 = vadd.f32 %v64_v7, %v63_v6 }
  0x24   :  { %73 = vadd.xlane.f32.xlu0 %v66_v8 }
  0xad   :  { %v74_v9 = vpop.xlane.xlu0 %73 }
  0xae   :  { %v75_v10 = vrot.slane %v74_v9, 4 }
  0xb0   :  { %v76_v11 = vadd.f32 %v75_v10, %v74_v9 }
  0xb2   :  { %v77_v12 = vrot.slane %v76_v11, 2 }
  0xb4   :  { %v78_v13 = vadd.f32 %v77_v12, %v76_v11 }
  0xb6   :  { %v79_v14 = vrot.slane %v78_v13, 1 }
  0xb8   :  { %v80_v15 = vadd.f32 %v79_v14, %v78_v13 }
  0xba   :  { %99 = vpush %v80_v15 }
  0xeb   :  { %s100_s0 = spop %99 }
  0xec   :  { %83 = sst [smem:[#allocation8]] %s100_s0 }
  0xed   :  { %91 = dma.smem_to_hbm %s164_s1, 16, %s191_s2, [#allocation5]  }
  0xee   :  { %158 = dma.done.wait [#allocation5], 16  }
  0xef   :  { %159 = vsyncadd [#allocation5], 4294967280 }
  0xf0   :  { %95 = sfence }
  0xf1   :  { %96 = vsyncpa [#allocation4], 1 }
  0xf2   :  { %97 = vsyncpa [#allocation7], 1 }
  0xf3   :  { %98 = vsyncpa [#allocation5], 1 }

</bundles_post_ra>
